<compile_context>
chip_gen: v7x
topology: tpu7x:2x2x1
jax: 0.10.0
libtpu: 0.0.40
codegen_flags: <defaults>
</compile_context>

<pallas_src>
import jax
import jax.numpy as jnp
from jax.experimental import pallas as pl
from jax.experimental.pallas import tpu as pltpu


def _round_up(n: int, m: int) -> int:
    return ((n + m - 1) // m) * m


def _pick_block(extent: int, max_block: int, align: int) -> int:
    """Largest multiple of `align` <= max_block that evenly divides `extent`
    (extent is a multiple of align).  Avoids rounding the extent up to the
    block size and paying for a nearly-dead extra tile."""
    units = extent // align
    max_units = max(1, max_block // align)
    for d in range(min(units, max_units), 0, -1):
        if units % d == 0:
            return d * align
    return align


def _vmem_physical_bytes() -> int:
    try:
        return int(pltpu.get_tpu_info().vmem_capacity_bytes)
    except Exception:
        return 64 << 20  # v7x floor -> safe cap on every generation


def decoder_kernel(x_ref, w1_ref, b1_ref, w2_ref, b2_ref, o_ref, h_ref):
    """Fused z -> Linear -> ReLU -> Linear -> sigmoid.

    Grid = (batch tile i ["parallel"], out tile j ["arbitrary"]).  The first
    GEMM + ReLU runs once per batch tile (at j == 0) into the VMEM scratch
    h_ref and is reused for every output tile j — no recompute.
    """
    @pl.when(pl.program_id(1) == 0)
    def _():
        x = x_ref[...].astype(jnp.bfloat16)                  # cast rides VALU
        h = jnp.dot(x, w1_ref[...], preferred_element_type=jnp.float32)
        h_ref[...] = jnp.maximum(h + b1_ref[...], 0.0).astype(jnp.bfloat16)

    y = jnp.dot(h_ref[...], w2_ref[...], preferred_element_type=jnp.float32)
    y = y + b2_ref[...]
    o_ref[...] = jax.nn.sigmoid(y).astype(o_ref.dtype)


def prepare_decoder_params(w1, b1, w2, b2):
    """One-time pad + bf16 cast of the weights (keep OUT of the hot path)."""
    z_dim, hidden = w1.shape
    out_size = w2.shape[1]
    hp = _round_up(hidden, 128)
    op = _round_up(out_size, 128)
    w1p = jnp.pad(w1, ((0, 0), (0, hp - hidden))).astype(jnp.bfloat16)
    b1p = jnp.pad(b1.reshape(1, -1), ((0, 0), (0, hp - hidden))).astype(jnp.float32)
    w2p = jnp.pad(w2, ((0, hp - hidden), (0, op - out_size))).astype(jnp.bfloat16)
    b2p = jnp.pad(b2.reshape(1, -1), ((0, 0), (0, op - out_size))).astype(jnp.float32)
    return w1p, b1p, w2p, b2p


def decoder_forward(x, w1p, b1p, w2p, b2p, *, out_size,
                    block_b=512, block_n=2048, out_dtype=jnp.bfloat16):
    """Fused decoder MLP.  x:(B,z) f32; w1p:(z,Hp) bf16; b1p:(1,Hp) f32;
    w2p:(Hp,Op) bf16; b2p:(1,Op) f32 — already padded/cast by
    prepare_decoder_params().  Returns (B, out_size) in out_dtype."""
    B, z_dim = x.shape
    assert w1p.shape[0] == z_dim
    hp = w1p.shape[1]
    op = w2p.shape[1]

    # ---- block sizes that divide the 8/128-rounded extents ----
    bp = _round_up(B, 8)
    block_b_eff = _pick_block(bp, block_b, 8)
    block_n_eff = _pick_block(op, block_n, 128)
    grid = (bp // block_b_eff, op // block_n_eff)

    # Only a (tiny) batch pad of x touches the hot path; the feature dim is
    # left unpadded and the bf16 cast happens inside the kernel.
    xp = x if bp == B else jnp.pad(x, ((0, bp - B), (0, 0)))

    # ---- VMEM budget: double-buffered tiles + bf16 h scratch + headroom ----
    out_bytes = jnp.dtype(out_dtype).itemsize
    x_bytes = jnp.dtype(xp.dtype).itemsize
    footprint = (
        2 * block_b_eff * z_dim * x_bytes               # x tiles
        + 2 * z_dim * hp * 2 + 2 * hp * 4               # W1 / b1 (resident)
        + 2 * hp * block_n_eff * 2                      # W2 tiles
        + 2 * block_n_eff * 4                           # b2 tiles
        + 2 * block_b_eff * block_n_eff * out_bytes     # out tiles
        + block_b_eff * hp * 2                          # h scratch (bf16)
    )
    vmem_limit = int(min(max(footprint + (8 << 20), 16 << 20),
                         _vmem_physical_bytes() - (8 << 20)))

    out = pl.pallas_call(
        decoder_kernel,
        out_shape=jax.ShapeDtypeStruct((bp, op), out_dtype),
        grid_spec=pltpu.PrefetchScalarGridSpec(
            num_scalar_prefetch=0,
            grid=grid,
            in_specs=[
                pl.BlockSpec((block_b_eff, z_dim), lambda i, j: (i, 0)),  # x
                pl.BlockSpec((z_dim, hp), lambda i, j: (0, 0)),           # W1
                pl.BlockSpec((1, hp), lambda i, j: (0, 0)),               # b1
                pl.BlockSpec((hp, block_n_eff), lambda i, j: (0, j)),     # W2
                pl.BlockSpec((1, block_n_eff), lambda i, j: (0, j)),      # b2
            ],
            out_specs=pl.BlockSpec((block_b_eff, block_n_eff),
                                   lambda i, j: (i, j)),
            scratch_shapes=[pltpu.VMEM((block_b_eff, hp), jnp.bfloat16)],
        ),
        compiler_params=pltpu.CompilerParams(
            dimension_semantics=("parallel", "arbitrary"),
            vmem_limit_bytes=vmem_limit,
        ),
    )(xp, w1p, b1p, w2p, b2p)

    return out[:B, :out_size]


def init_decoder_params(key, z_dim, hidden, out_size):
    k1, k2, k3, k4 = jax.random.split(key, 4)
    # Deterministic, PyTorch-Linear-like uniform init scaled by fan-in.
    w1 = jax.random.uniform(k1, (z_dim, hidden), jnp.float32, -1.0, 1.0) / jnp.sqrt(z_dim)
    b1 = jax.random.uniform(k2, (hidden,), jnp.float32, -1.0, 1.0) / jnp.sqrt(z_dim)
    w2 = jax.random.uniform(k3, (hidden, out_size), jnp.float32, -1.0, 1.0) / jnp.sqrt(hidden)
    b2 = jax.random.uniform(k4, (out_size,), jnp.float32, -1.0, 1.0) / jnp.sqrt(hidden)
    return w1, b1, w2, b2


def decoder_ref(x, w1, b1, w2, b2):
    h = jnp.maximum(x @ w1 + b1[None, :], 0.0)
    return jax.nn.sigmoid(h @ w2 + b2[None, :])


if __name__ == "__main__":
    # Small demo shapes (out_size deliberately not a multiple of 128 to
    # exercise the padding / lane-dense-output path).
    B, z_dim, hidden, out_size = 8, 32, 64, 100

    key = jax.random.PRNGKey(0)
    kx, kp = jax.random.split(key)
    x = jax.random.normal(kx, (B, z_dim), jnp.float32)
    w1, b1, w2, b2 = init_decoder_params(kp, z_dim, hidden, out_size)

    # One-time pad/cast of weights (off the hot path).
    params = prepare_decoder_params(w1, b1, w2, b2)

    out = decoder_forward(x, *params, out_size=out_size)
    out = jax.block_until_ready(out)

    ref = decoder_ref(x, w1, b1, w2, b2)
    assert out.shape == (B, out_size)
    # bf16 MXU operands + bf16 output with f32 accumulation -> relaxed tol.
    assert jnp.allclose(out.astype(jnp.float32), ref, atol=2e-2, rtol=2e-2), float(
        jnp.max(jnp.abs(out.astype(jnp.float32) - ref)))

    print("KERNEL_OK")
</pallas_src>

<mosaic_0001>
module attributes {stable_mosaic.version = 11 : i64} {
  func.func @decoder_kernel(%arg0: i32, %arg1: i32, %arg2: memref<8x32xf32, #tpu.memory_space<vmem>>, %arg3: memref<32x128xbf16, #tpu.memory_space<vmem>>, %arg4: memref<1x128xf32, #tpu.memory_space<vmem>>, %arg5: memref<128x128xbf16, #tpu.memory_space<vmem>>, %arg6: memref<1x128xf32, #tpu.memory_space<vmem>>, %arg7: memref<8x128xbf16, #tpu.memory_space<vmem>>, %arg8: memref<8x128xbf16, #tpu.memory_space<vmem>>) attributes {dimension_semantics = [#tpu.dimension_semantics<parallel>, #tpu.dimension_semantics<arbitrary>], iteration_bounds = array<i64: 1, 1>, scalar_prefetch = 0 : i64, scratch_operands = 1 : i64, tpu.core_type = #tpu.core_type<tc>, window_params = [{transform_indices = @transform_0, window_bounds = array<i64: 8, 32>}, {pipeline_mode = #tpu.pipeline_mode<synchronous>, transform_indices = @transform_1, window_bounds = array<i64: 32, 128>}, {pipeline_mode = #tpu.pipeline_mode<synchronous>, transform_indices = @transform_2, window_bounds = array<i64: 1, 128>}, {transform_indices = @transform_3, window_bounds = array<i64: 128, 128>}, {transform_indices = @transform_4, window_bounds = array<i64: 1, 128>}, {transform_indices = @transform_5, window_bounds = array<i64: 8, 128>}]} {
    %c0_i32 = arith.constant 0 : i32
    %0 = arith.cmpi eq, %arg1, %c0_i32 : i32
    %1 = arith.extui %0 : i1 to i32
    %c0_i32_0 = arith.constant 0 : i32
    %2 = arith.cmpi ne, %1, %c0_i32_0 : i32
    scf.if %2 {
      %c0_9 = arith.constant 0 : index
      %c0_10 = arith.constant 0 : index
      %16 = vector.load %arg2[%c0_9, %c0_10] : memref<8x32xf32, #tpu.memory_space<vmem>>, vector<8x32xf32>
      %17 = arith.truncf %16 : vector<8x32xf32> to vector<8x32xbf16>
      %c0_11 = arith.constant 0 : index
      %c0_12 = arith.constant 0 : index
      %18 = vector.load %arg3[%c0_11, %c0_12] : memref<32x128xbf16, #tpu.memory_space<vmem>>, vector<32x128xbf16>
      %cst_13 = arith.constant dense<0.000000e+00> : vector<8x128xf32>
      %19 = tpu.matmul %17, %18, %cst_13 {dimension_numbers = #tpu.dot_dimension_numbers<[1], [0], [0], [1], [0, 0, 1, 1], [], []>} : vector<8x32xbf16>, vector<32x128xbf16>, vector<8x128xf32> -> vector<8x128xf32>
      %c0_14 = arith.constant 0 : index
      %c0_15 = arith.constant 0 : index
      %20 = vector.load %arg4[%c0_14, %c0_15] : memref<1x128xf32, #tpu.memory_space<vmem>>, vector<1x128xf32>
      %21 = vector.broadcast %20 : vector<1x128xf32> to vector<8x128xf32>
      %22 = arith.addf %19, %21 : vector<8x128xf32>
      %cst_16 = arith.constant 0.000000e+00 : f32
      %23 = vector.broadcast %cst_16 : f32 to vector<8x128xf32>
      %24 = arith.maximumf %22, %23 : vector<8x128xf32>
      %25 = arith.truncf %24 : vector<8x128xf32> to vector<8x128xbf16>
      %c0_17 = arith.constant 0 : index
      %c0_18 = arith.constant 0 : index
      %26 = vector.load %arg8[%c0_17, %c0_18] : memref<8x128xbf16, #tpu.memory_space<vmem>>, vector<8x128xbf16>
      tpu.vector_store %arg8[%c0_17, %c0_18], %25 {strides = array<i32>} : memref<8x128xbf16, #tpu.memory_space<vmem>>, vector<8x128xbf16>,
    } else {
    }
    %c0 = arith.constant 0 : index
    %c0_1 = arith.constant 0 : index
    %3 = vector.load %arg8[%c0, %c0_1] : memref<8x128xbf16, #tpu.memory_space<vmem>>, vector<8x128xbf16>
    %c0_2 = arith.constant 0 : index
    %c0_3 = arith.constant 0 : index
    %4 = vector.load %arg5[%c0_2, %c0_3] : memref<128x128xbf16, #tpu.memory_space<vmem>>, vector<128x128xbf16>
    %cst = arith.constant dense<0.000000e+00> : vector<8x128xf32>
    %5 = tpu.matmul %3, %4, %cst {dimension_numbers = #tpu.dot_dimension_numbers<[1], [0], [0], [1], [0, 0, 1, 1], [], []>} : vector<8x128xbf16>, vector<128x128xbf16>, vector<8x128xf32> -> vector<8x128xf32>
    %c0_4 = arith.constant 0 : index
    %c0_5 = arith.constant 0 : index
    %6 = vector.load %arg6[%c0_4, %c0_5] : memref<1x128xf32, #tpu.memory_space<vmem>>, vector<1x128xf32>
    %7 = vector.broadcast %6 : vector<1x128xf32> to vector<8x128xf32>
    %8 = arith.addf %5, %7 : vector<8x128xf32>
    %9 = arith.negf %8 : vector<8x128xf32>
    %10 = math.exp %9 : vector<8x128xf32>
    %cst_6 = arith.constant 1.000000e+00 : f32
    %11 = vector.broadcast %cst_6 : f32 to vector<8x128xf32>
    %12 = arith.addf %11, %10 : vector<8x128xf32>
    %13 = arith.divf %11, %12 : vector<8x128xf32>
    %14 = arith.truncf %13 : vector<8x128xf32> to vector<8x128xbf16>
    %c0_7 = arith.constant 0 : index
    %c0_8 = arith.constant 0 : index
    %15 = vector.load %arg7[%c0_7, %c0_8] : memref<8x128xbf16, #tpu.memory_space<vmem>>, vector<8x128xbf16>
    tpu.vector_store %arg7[%c0_7, %c0_8], %14 {strides = array<i32>} : memref<8x128xbf16, #tpu.memory_space<vmem>>, vector<8x128xbf16>,
    return
  }
  func.func @transform_0(%arg0: i32, %arg1: i32) -> (i32, i32) {
    %c0_i32 = arith.constant 0 : i32
    %c0_i32_0 = arith.constant 0 : i32
    return %arg0, %c0_i32 : i32, i32
  }
  func.func @transform_1(%arg0: i32, %arg1: i32) -> (i32, i32) {
    %c0_i32 = arith.constant 0 : i32
    %c0_i32_0 = arith.constant 0 : i32
    %c0_i32_1 = arith.constant 0 : i32
    return %c0_i32, %c0_i32_0 : i32, i32
  }
  func.func @transform_2(%arg0: i32, %arg1: i32) -> (i32, i32) {
    %c0_i32 = arith.constant 0 : i32
    %c0_i32_0 = arith.constant 0 : i32
    %c0_i32_1 = arith.constant 0 : i32
    return %c0_i32, %c0_i32_0 : i32, i32
  }
  func.func @transform_3(%arg0: i32, %arg1: i32) -> (i32, i32) {
    %c0_i32 = arith.constant 0 : i32
    %c0_i32_0 = arith.constant 0 : i32
    return %c0_i32, %arg1 : i32, i32
  }
  func.func @transform_4(%arg0: i32, %arg1: i32) -> (i32, i32) {
    %c0_i32 = arith.constant 0 : i32
    %c0_i32_0 = arith.constant 0 : i32
    return %c0_i32, %arg1 : i32, i32
  }
  func.func @transform_5(%arg0: i32, %arg1: i32) -> (i32, i32) {
    %c0_i32 = arith.constant 0 : i32
    return %arg0, %arg1 : i32, i32
  }
}

</mosaic_0001>

<bundles_post_ra>
// kernel: tpu_custom_call.1
= control target key start
LH: loop header
LB: loop body
LE: loop exit
PB: predicated region body
PF: predicated region fallthrough
CT: control target
= control target key end

     0   :  { %10 = vsyncpa [#allocation4], 0  ;;  %s541_s0 = inlined_call_operand.hbm [shape: f32[8,32], index: 0, kind: input, shape index: {}]   ;;  %s542_s1 = inlined_call_operand.hbm [shape: bf16[32,128], index: 1, kind: input, shape index: {}]   ;;  %s543_s2 = inlined_call_operand.vmem [shape: f32[1,128], index: 2, kind: input, shape index: {}]   ;;  %s544_s3 = inlined_call_operand.hbm [shape: bf16[128,128], index: 3, kind: input, shape index: {}]   ;;  %s545_s4 = inlined_call_operand.vmem [shape: f32[1,128], index: 4, kind: input, shape index: {}]   ;;  %s546_s5 = inlined_call_operand.hbm [shape: bf16[8,128], index: 5, kind: output, shape index: {}]  }
   0x1   :  { %11 = vsyncpa [#allocation7], 0 }
   0x2   :  { %12 = vsyncpa [#allocation5], 0  ;;  %s443_s18 = smov [#allocation6]   ;;  %s349_s22 = scalar_lea.hbm %s542_s1, 256 }
   0x3   :  { %s28_s19 = sshll.u32 %s443_s18, 4  ;;  %p350_p0 = scmp.ne.s32.totalorder %s542_s1, %s349_s22  ;;  %s29_s19 = int_to_ptr.vmem [resolvable:$true] %s28_s19 }
   0x4   :  { %p353_p1 = scmp.lt.u32.totalorder %s349_s22, %s542_s1 }
   0x6   :  { %p355_p2 = pnand %p353_p1, %p350_p0 }
   0x8   :  { %358 = shalt.err (!%p355_p2)
}
   0x9   :  { %s359_s27 = scalar_lea.vmem %s29_s19, 256  ;;  %p364_p4 = scmp.lt.s32.totalorder %s29_s19, %s29_s19 }
   0xa   :  { %p360_p3 = scmp.ne.s32.totalorder %s29_s19, %s359_s27  ;;  %p365_p5 = scmp.lt.s32.totalorder %s359_s27, %s359_s27 }
   0xc   :  { %p366_p6 = por %p365_p5, %p364_p4 }
   0xe   :  { %p367_p7 = pnand %p366_p6, %p360_p3 }
  0x10   :  { %370 = shalt.err (!%p367_p7)
}
  0x11   :  { %s444_s28 = smov 64   ;;  %s445_s29 = smov 4  }
  0x12   :  { %34 = dma.hbm_to_vmem [thread:$0]  %s542_s1, 256, %s29_s19, [#allocation7], %s444_s28, %s444_s28, %s445_s29  }
  0x13   :  { %s446_s7 = smov [#allocation3]   ;;  %s447_s9 = smov [#allocation8]  }
  0x14   :  { %s19_s8 = sshll.u32 %s446_s7, 4  ;;  %s42_s10 = sshll.u32 %s447_s9, 4  ;;  %s20_s8 = int_to_ptr.vmem [resolvable:$true] %s19_s8  ;;  %s43_s10 = int_to_ptr.vmem [resolvable:$true] %s42_s10 }
  0x15   :  { %s371_s13 = scalar_lea.hbm %s541_s0, 128 }
  0x16   :  { %p372_p8 = scmp.ne.s32.totalorder %s541_s0, %s371_s13  ;;  %p375_p9 = scmp.lt.u32.totalorder %s371_s13, %s541_s0 }
  0x18   :  { %p377_p10 = pnand %p375_p9, %p372_p8 }
  0x1a   :  { %380 = shalt.err (!%p377_p10)
}
  0x1b   :  { %s381_s1 = scalar_lea.vmem %s20_s8, 128  ;;  %p386_p12 = scmp.lt.s32.totalorder %s20_s8, %s20_s8 }
  0x1c   :  { %p382_p11 = scmp.ne.s32.totalorder %s20_s8, %s381_s1  ;;  %p387_p13 = scmp.lt.s32.totalorder %s381_s1, %s381_s1 }
  0x1e   :  { %p388_p0 = por %p387_p13, %p386_p12 }
  0x20   :  { %p389_p1 = pnand %p388_p0, %p382_p11 }
  0x22   :  { %392 = shalt.err (!%p389_p1)
}
  0x23   :  { %22 = dma.hbm_to_vmem [thread:$0]  %s541_s0, 128, %s20_s8, [#allocation4]  }
  0x24   :  { %s393_s22 = scalar_lea.hbm %s544_s3, 1024 }
  0x25   :  { %p394_p2 = scmp.ne.s32.totalorder %s544_s3, %s393_s22  ;;  %p397_p3 = scmp.lt.u32.totalorder %s393_s22, %s544_s3 }
  0x27   :  { %p399_p4 = pnand %p397_p3, %p394_p2 }
  0x29   :  { %402 = shalt.err (!%p399_p4)
}
  0x2a   :  { %s403_s27 = scalar_lea.vmem %s43_s10, 1024  ;;  %p408_p6 = scmp.lt.s32.totalorder %s43_s10, %s43_s10 }
  0x2b   :  { %p404_p5 = scmp.ne.s32.totalorder %s43_s10, %s403_s27  ;;  %p409_p7 = scmp.lt.s32.totalorder %s403_s27, %s403_s27 }
  0x2d   :  { %p410_p8 = por %p409_p7, %p408_p6 }
  0x2f   :  { %p411_p9 = pnand %p410_p8, %p404_p5 }
  0x31   :  { %414 = shalt.err (!%p411_p9)
}
  0x32   :  { %48 = dma.hbm_to_vmem [thread:$0]  %s544_s3, 1024, %s43_s10, [#allocation7], %s444_s28, %s444_s28, %s445_s29  }
  0x33   :  { %437 = dma.done.wait [#allocation4], 128  }
  0x34   :  { %438 = vsyncadd [#allocation4], 4294967168 }
  0x35   :  { %439 = dma.done.wait [#allocation7], 1280  }
  0x36   :  { %440 = vsyncadd [#allocation7], 4294966016  ;;  %v448_v0 = vmov 0.0   ;;  %vm449_vm0 = vmmov 0   ;;  %v335_v1 = vld [vmem:[#allocation6] sm:$0xff]   ;;  %v336_v2 = vld [vmem:[#allocation6 + $0x8] sm:$0xff]  }
  0x37   :  { %299 = vmatprep.subr.bf16.mxu0 %v448_v0  ;;  %303 = vmatprep.mubr.msk.bf16.mxu0 %vm449_vm0, %v448_v0  ;;  %v65_v3 = vld [vmem:[#allocation3] sm:$0xff]  ;;  %v337_v4 = vld [vmem:[#allocation8] sm:$0xff]   ;;  %vm90_vm1 = vcmask 261120   ;;  %v339_v7 = vld [vmem:[#allocation8 + $0x10] sm:$0xff]  }
  0x38   :  { %307 = vmatprep.subr.bf16.mxu1 %v448_v0  ;;  %323 = vmatprep.mubr.msk.bf16.mxu1 %vm449_vm0, %v448_v0  ;;  %v66_v5 = vpack.c.bf16 %v65_v3, %v65_v3  ;;  %v338_v6 = vld [vmem:[#allocation8 + $0x8] sm:$0xff]   ;;  %v340_v8 = vld [vmem:[#allocation8 + $0x18] sm:$0xff]   ;;  %v341_v9 = vld [vmem:[#allocation8 + $0x20] sm:$0xff]  }
  0x39   :  { %300 = vmatpush3.bf16.msra.mxu0 %v335_v1  ;;  %308 = vmatpush3.bf16.msra.mxu1 %v337_v4  ;;  %v342_v10 = vld [vmem:[#allocation8 + $0x28] sm:$0xff]   ;;  %v343_v11 = vld [vmem:[#allocation8 + $0x30] sm:$0xff]   ;;  %v344_v12 = vld [vmem:[#allocation8 + $0x38] sm:$0xff]  }
  0x3a   :  { %301 = vmatprep.subr.bf16.mxu0 %v448_v0  ;;  %309 = vmatprep.subr.bf16.mxu1 %v448_v0  ;;  %v273_v13 = vld [vmem:[%s543_s2] ss:$0 sm:$0xff]  ;;  %s450_s2 = smov [#allocation9]  }
  0x3b   :  { %v277_v22 = vld [vmem:[%s545_s4] ss:$0 sm:$0xff]  ;;  %s263_s7 = sshll.u32 %s450_s2, 4  ;;  %s264_s7 = int_to_ptr.vmem [resolvable:$true] %s263_s7 }
  0x3c   :  { %s415_s8 = scalar_lea.vmem %s264_s7, 64  ;;  %p420_p11 = scmp.lt.s32.totalorder %s264_s7, %s264_s7 }
  0x3d   :  { %302 = vmatpush3.bf16.msra.mxu0 %v336_v2  ;;  %310 = vmatpush3.bf16.msra.mxu1 %v338_v6  ;;  %p416_p10 = scmp.ne.s32.totalorder %s264_s7, %s415_s8  ;;  %p421_p12 = scmp.lt.s32.totalorder %s415_s8, %s415_s8 }
  0x3e   :  { %311 = vmatprep.subr.bf16.mxu1 %v448_v0 }
  0x3f   :  { %p422_p13 = por %p421_p12, %p420_p11 }
  0x40   :  { %304 = vmatmul.mubr.msk.bf16.vlgmr.msra.gmra.mrb[0].mxu0 %vm90_vm1, %v66_v5 }
  0x41   :  { %312 = vmatpush3.bf16.msra.mxu1 %v339_v7  ;;  %p423_p0 = pnand %p422_p13, %p416_p10 }
  0x42   :  { %313 = vmatprep.subr.bf16.mxu1 %v448_v0 }
  0x45   :  { %314 = vmatpush3.bf16.msra.mxu1 %v340_v8 }
  0x46   :  { %315 = vmatprep.subr.bf16.mxu1 %v448_v0 }
  0x49   :  { %316 = vmatpush3.bf16.msra.mxu1 %v341_v9 }
  0x4a   :  { %317 = vmatprep.subr.bf16.mxu1 %v448_v0 }
  0x4d   :  { %318 = vmatpush3.bf16.msra.mxu1 %v342_v10 }
  0x4e   :  { %319 = vmatprep.subr.bf16.mxu1 %v448_v0 }
  0x51   :  { %320 = vmatpush3.bf16.msra.mxu1 %v343_v11 }
  0x52   :  { %321 = vmatprep.subr.bf16.mxu1 %v448_v0 }
  0x55   :  { %322 = vmatpush3.bf16.msra.mxu1 %v344_v12 }
 0x113   :  { %v128_v14 = vpop.f32.mrb[0].mxu0 }
 0x114   :  { %v129_v15 = vadd.f32 %v273_v13, %v128_v14  ;;  %v305_v16 = vpop.f32.mrb[1].mxu0 }
 0x115   :  { %v131_v17 = vpop.f32.mrb[2].mxu0 }
 0x116   :  { %v134_v18 = vmax.f32 %v129_v15, 0.0  ;;  %v306_v19 = vpop.f32.mrb[3].mxu0 }
 0x118   :  { %v135_v20 = vpack.c.bf16 %v134_v18, %v134_v18 }
 0x11a   :  { %136 = vst [vmem:[#allocation2] sm:$0xf] %v135_v20 }
 0x121   :  { %v137_v21 = vld [vmem:[#allocation2] sm:$0xf] }
 0x122   :  { %324 = vmatmul.mubr.bf16.vlgmr.msra.gmra.mrb[0].mxu1 %v137_v21 }
 0x1f5   :  { %v243_v23 = vpop.f32.mrb[0].mxu1 }
 0x1f6   :  { %v244_v24 = vadd.f32 %v277_v22, %v243_v23  ;;  %v325_v25 = vpop.f32.mrb[1].mxu1 }
 0x1f7   :  { %v246_v26 = vpop.f32.mrb[2].mxu1 }
 0x1f8   :  { %v286_v27 = vmul.f32 -1.442695, %v244_v24  ;;  %v326_v28 = vpop.f32.mrb[3].mxu1 }
 0x1fa   :  { %345 = vpow2.f32 %v286_v27 }
 0x204   :  { %v346_v29 = vpop.eup %345 }
 0x205   :  { %v252_v30 = vadd.f32 1.0, %v346_v29 }
 0x207   :  { %347 = vrcp.f32 %v252_v30 }
 0x211   :  { %v348_v31 = vpop.eup %347 }
 0x212   :  { %v255_v32 = vpack.c.bf16 %v348_v31, %v348_v31 }
 0x214   :  { %256 = vst [vmem:[#allocation9] sm:$0xf] %v255_v32 }
 0x215   :  { %426 = shalt.err (!%p423_p0)
}
 0x216   :  { %s427_s10 = scalar_lea.hbm %s546_s5, 64 }
 0x217   :  { %p428_p1 = scmp.ne.s32.totalorder %s546_s5, %s427_s10  ;;  %p431_p2 = scmp.lt.u32.totalorder %s427_s10, %s546_s5 }
 0x219   :  { %p433_p3 = pnand %p431_p2, %p428_p1 }
 0x21b   :  { %436 = shalt.err (!%p433_p3)
}
 0x21c   :  { %266 = dma.vmem_to_hbm [thread:$0]  %s264_s7, 64, %s546_s5, [#allocation5]  }
 0x21d   :  { %441 = dma.done.wait [#allocation5], 64  }
 0x21e   :  { %442 = vsyncadd [#allocation5], 4294967232 }
 0x21f   :  { %270 = vsyncpa [#allocation4], 1 }
 0x220   :  { %271 = vsyncpa [#allocation7], 1 }
 0x221   :  { %272 = vsyncpa [#allocation5], 1 }

</bundles_post_ra>
